<compile_context>
chip_gen: v5e
topology: v5e:2x2
jax: 0.10.0
libtpu: 0.0.40
codegen_flags: <defaults>
</compile_context>

<pallas_src>
import functools

import numpy as np
import jax
import jax.numpy as jnp
from jax.experimental import pallas as pl
from jax.experimental.pallas import tpu as pltpu


# ----------------------------- Pallas kernel --------------------------------
def _wt_x_bias_relu_kernel(wt_ref, x_ref, b_ref, o_ref):
    # (ncol, Cin) @ (Cin, tm) on the MXU (f32 accumulate); bias + ReLU on the VPU.
    acc = jnp.dot(wt_ref[...], x_ref[...], preferred_element_type=jnp.float32)
    o_ref[...] = jnp.maximum(acc + b_ref[...], 0.0).astype(o_ref.dtype)


def _fused_conv_transpose_core(wt, x3, b2, tm, out_dtype):
    """wt: (ncol, Cin), x3: (N, Cin, Mp), b2: (ncol, 1) ->
       relu(wt @ x3[n] + b2) per batch, tiled over the spatial (lane) axis."""
    N, cin, Mp = x3.shape
    ncol = wt.shape[0]
    assert Mp % tm == 0 and tm % 128 == 0
    return pl.pallas_call(
        _wt_x_bias_relu_kernel,
        out_shape=jax.ShapeDtypeStruct((N, ncol, Mp), out_dtype),
        grid=(N, Mp // tm),
        in_specs=[
            # Weight / bias blocks have a constant index -> stay VMEM-resident.
            pl.BlockSpec((ncol, cin), lambda n, j: (0, 0)),
            pl.BlockSpec((None, cin, tm), lambda n, j: (n, 0, j)),
            pl.BlockSpec((ncol, 1), lambda n, j: (0, 0)),
        ],
        out_specs=pl.BlockSpec((None, ncol, tm), lambda n, j: (n, 0, j)),
        compiler_params=pltpu.CompilerParams(
            dimension_semantics=("parallel", "parallel"),
            vmem_limit_bytes=32 << 20),
    )(wt, x3, b2)


# ----------------------------- tiling heuristics -----------------------------
def _choose_spatial_tile(M, N, cin, ncol, in_itemsize, out_itemsize):
    """Pick the spatial tile width (multiple of 128) and the padded spatial size."""
    LANE = 128
    # ~2 MiB combined (input + output) per grid step: double-buffered that is
    # ~4-5 MiB of VMEM, comfortably under every generation's scoped limit.
    budget = 2 << 20
    bytes_per_col = cin * in_itemsize + ncol * out_itemsize
    cap = max(LANE, (budget // bytes_per_col) // LANE * LANE)
    # At least ~8 total grid steps (>= 4 per TensorCore on v7x) when M allows.
    min_steps = 8
    tiles_per_batch = -(-min_steps // max(1, N))
    cap = min(cap, max(LANE, (M // tiles_per_batch) // LANE * LANE))
    if M % LANE == 0:
        units = M // LANE
        for d in range(min(units, cap // LANE), 0, -1):
            if units % d == 0:                     # exact tiling -> no padding pass
                return d * LANE, M
    tm = cap
    Mp = -(-M // tm) * tm
    return tm, Mp


# ----------------------------- Lipschitz constraint --------------------------
def _spectral_norm(wmat, iters=20):
    """Largest singular value via power iteration on the smaller Gram matrix."""
    if wmat.shape[0] <= wmat.shape[1]:
        g = wmat @ wmat.T                          # (Cin, Cin)
    else:
        g = wmat.T @ wmat                          # (ncol, ncol)
    n = g.shape[0]
    v0 = jax.random.normal(jax.random.PRNGKey(1234), (n,), wmat.dtype)
    v0 = v0 / (jnp.linalg.norm(v0) + 1e-12)

    def body(_, v):
        u = g @ v
        return u / (jnp.linalg.norm(u) + 1e-12)

    v = jax.lax.fori_loop(0, iters, body, v0)
    lam = v @ (g @ v)                              # Rayleigh quotient ~ lambda_max
    return jnp.sqrt(jnp.maximum(lam, 0.0))


def _constrained_weight(weight, max_lc):
    # TODO(synk): source of L.L2LipschitzConvTranspose3d is unavailable; implemented
    # as W * min(1, max_lc / sigma), sigma = exact operator L2 norm (spectral norm of
    # the (Cin, Cout*ks^3) matrix) for the non-overlapping stride==ks, padding==0 case.
    in_ch, out_ch, kd, kh, kw = weight.shape
    wmat = weight.reshape(in_ch, out_ch * kd * kh * kw)
    sigma = _spectral_norm(wmat)
    scale = jnp.minimum(1.0, max_lc / (sigma + 1e-12))
    return weight * scale


# ----------------------------- jitted forward --------------------------------
def _nettc_forward(x, weight, bias, max_lc, *, ks, out_ch, compute_dtype, out_dtype):
    N, cin, D, H, W = x.shape
    k3 = ks ** 3
    ncol = out_ch * k3
    M = D * H * W

    w = _constrained_weight(weight, max_lc)
    wt = w.reshape(cin, ncol).T.astype(compute_dtype)   # (ncol, cin); rows (co,kd,kh,kw)
    b2 = jnp.repeat(bias, k3).reshape(ncol, 1).astype(jnp.float32)

    x3 = x.reshape(N, cin, M).astype(compute_dtype)     # free: NCDHW is row-major
    tm, Mp = _choose_spatial_tile(M, N, cin, ncol,
                                  jnp.dtype(compute_dtype).itemsize,
                                  jnp.dtype(out_dtype).itemsize)
    if Mp != M:
        x3 = jnp.pad(x3, ((0, 0), (0, 0), (0, Mp - M)))

    yp = _fused_conv_transpose_core(wt, x3, b2, tm, out_dtype)   # (N, ncol, Mp)

    y = yp[:, :, :M] if Mp != M else yp
    # TODO(synk): the kd/kh/kw interleave below is the one remaining XLA relayout
    # pass over the output; writing it from the kernel would need a non-rectangular
    # output BlockSpec (strided scatter), so it is left to XLA.
    y = y.reshape(N, out_ch, ks, ks, ks, D, H, W)
    y = jnp.transpose(y, (0, 1, 5, 2, 6, 3, 7, 4))      # (N, Co, D, kd, H, kh, W, kw)
    return y.reshape(N, out_ch, D * ks, H * ks, W * ks)


# ----------------------------- module wrapper --------------------------------
class NetTCPallas:
    """forward(x) = relu(ConvTranspose3d(x)) with L2-Lipschitz-constrained weight.

    Restricted to the non-overlapping upsample config stride == ks, padding == 0.
    """

    def __init__(self, in_ch, out_ch, ks, padding, stride, in_size, max_lc, key,
                 compute_dtype=jnp.float32, out_dtype=jnp.float32):
        assert stride == ks and padding == 0, "only non-overlapping upsample supported"
        # TODO(synk): general stride/padding (overlap-add) conv-transpose not implemented.
        self.in_ch, self.out_ch, self.ks, self.stride = in_ch, out_ch, ks, stride
        self.padding, self.max_lc = padding, max_lc
        kw, kb = jax.random.split(key)
        bound = 1.0 / np.sqrt(in_ch * ks ** 3)
        # torch ConvTranspose3d weight layout: (in_ch, out_ch, kD, kH, kW)
        self.weight = jax.random.uniform(
            kw, (in_ch, out_ch, ks, ks, ks), jnp.float32, -bound, bound)
        self.bias = jax.random.uniform(kb, (out_ch,), jnp.float32, -bound, bound)
        self._fwd = jax.jit(functools.partial(
            _nettc_forward, ks=ks, out_ch=out_ch,
            compute_dtype=compute_dtype, out_dtype=out_dtype))

    def constrained_weight(self):
        return _constrained_weight(self.weight, jnp.float32(self.max_lc))

    def __call__(self, x):
        return self._fwd(x, self.weight, self.bias, jnp.float32(self.max_lc))


# ----------------------------- reference (pure JAX) --------------------------
def _reference(x, w, b, ks, stride, padding):
    # conv_transpose == dilated conv with flipped, role-swapped kernel.
    rhs = jnp.flip(jnp.transpose(w, (1, 0, 2, 3, 4)), axis=(2, 3, 4))  # OIDHW
    pad = ks - 1 - padding
    y = jax.lax.conv_general_dilated(
        x, rhs, window_strides=(1, 1, 1),
        padding=[(pad, pad)] * 3,
        lhs_dilation=(stride,) * 3,
        dimension_numbers=("NCDHW", "OIDHW", "NCDHW"))
    y = y + b[None, :, None, None, None]
    return jnp.maximum(y, 0.0)


if __name__ == "__main__":
    key = jax.random.PRNGKey(0)
    kparam, kx = jax.random.split(key)

    in_ch, out_ch, ks, padding, stride = 8, 4, 2, 0, 2
    N, D, H, W = 2, 8, 8, 8
    max_lc = 1.0

    net = NetTCPallas(in_ch, out_ch, ks, padding, stride, (D, H, W), max_lc, kparam)
    x = jax.random.normal(kx, (N, in_ch, D, H, W), jnp.float32)

    out = jax.block_until_ready(net(x))

    ref = _reference(x, net.constrained_weight(), net.bias, ks, stride, padding)
    np.testing.assert_allclose(np.asarray(out), np.asarray(ref), rtol=1e-4, atol=1e-4)

    print("KERNEL_OK")
</pallas_src>

<mosaic_0001>
module attributes {stable_mosaic.version = 11 : i64} {
  func.func @_wt_x_bias_relu_kernel(%arg0: i32, %arg1: i32, %arg2: memref<32x8xf32, #tpu.memory_space<vmem>>, %arg3: memref<1x8x128xf32, #tpu.memory_space<vmem>>, %arg4: memref<32x1xf32, #tpu.memory_space<vmem>>, %arg5: memref<1x32x128xf32, #tpu.memory_space<vmem>>) attributes {dimension_semantics = [#tpu.dimension_semantics<parallel>, #tpu.dimension_semantics<parallel>], iteration_bounds = array<i64: 2, 4>, scalar_prefetch = 0 : i64, scratch_operands = 0 : i64, tpu.core_type = #tpu.core_type<tc>, window_params = [{pipeline_mode = #tpu.pipeline_mode<synchronous>, transform_indices = @transform_0, window_bounds = array<i64: 32, 8>}, {transform_indices = @transform_1, window_bounds = array<i64: 1, 8, 128>}, {pipeline_mode = #tpu.pipeline_mode<synchronous>, transform_indices = @transform_2, window_bounds = array<i64: 32, 1>}, {transform_indices = @transform_3, window_bounds = array<i64: 1, 32, 128>}]} {
    %c0 = arith.constant 0 : index
    %c0_0 = arith.constant 0 : index
    %0 = vector.load %arg2[%c0, %c0_0] : memref<32x8xf32, #tpu.memory_space<vmem>>, vector<32x8xf32>
    %c0_1 = arith.constant 0 : index
    %c0_2 = arith.constant 0 : index
    %c0_3 = arith.constant 0 : index
    %1 = vector.load %arg3[%c0_1, %c0_2, %c0_3] : memref<1x8x128xf32, #tpu.memory_space<vmem>>, vector<1x8x128xf32>
    %2 = vector.shape_cast %1 : vector<1x8x128xf32> to vector<8x128xf32>
    %cst = arith.constant dense<0.000000e+00> : vector<32x128xf32>
    %3 = tpu.matmul %0, %2, %cst {dimension_numbers = #tpu.dot_dimension_numbers<[1], [0], [0], [1], [0, 0, 1, 1], [], []>} : vector<32x8xf32>, vector<8x128xf32>, vector<32x128xf32> -> vector<32x128xf32>
    %c0_4 = arith.constant 0 : index
    %c0_5 = arith.constant 0 : index
    %4 = vector.load %arg4[%c0_4, %c0_5] : memref<32x1xf32, #tpu.memory_space<vmem>>, vector<32x1xf32>
    %5 = vector.broadcast %4 : vector<32x1xf32> to vector<32x128xf32>
    %6 = arith.addf %3, %5 : vector<32x128xf32>
    %cst_6 = arith.constant 0.000000e+00 : f32
    %7 = vector.broadcast %cst_6 : f32 to vector<32x128xf32>
    %8 = arith.maximumf %6, %7 : vector<32x128xf32>
    %c0_7 = arith.constant 0 : index
    %c0_8 = arith.constant 0 : index
    %c0_9 = arith.constant 0 : index
    %9 = vector.load %arg5[%c0_7, %c0_8, %c0_9] : memref<1x32x128xf32, #tpu.memory_space<vmem>>, vector<1x32x128xf32>
    %10 = vector.shape_cast %9 : vector<1x32x128xf32> to vector<32x128xf32>
    %11 = vector.shape_cast %8 : vector<32x128xf32> to vector<1x32x128xf32>
    tpu.vector_store %arg5[%c0_7, %c0_8, %c0_9], %11 {strides = array<i32>} : memref<1x32x128xf32, #tpu.memory_space<vmem>>, vector<1x32x128xf32>,
    return
  }
  func.func @transform_0(%arg0: i32, %arg1: i32) -> (i32, i32) {
    %c0_i32 = arith.constant 0 : i32
    %c0_i32_0 = arith.constant 0 : i32
    %c0_i32_1 = arith.constant 0 : i32
    return %c0_i32, %c0_i32_0 : i32, i32
  }
  func.func @transform_1(%arg0: i32, %arg1: i32) -> (i32, i32, i32) {
    %c0_i32 = arith.constant 0 : i32
    %c0_i32_0 = arith.constant 0 : i32
    return %arg0, %c0_i32, %arg1 : i32, i32, i32
  }
  func.func @transform_2(%arg0: i32, %arg1: i32) -> (i32, i32) {
    %c0_i32 = arith.constant 0 : i32
    %c0_i32_0 = arith.constant 0 : i32
    %c0_i32_1 = arith.constant 0 : i32
    return %c0_i32, %c0_i32_0 : i32, i32
  }
  func.func @transform_3(%arg0: i32, %arg1: i32) -> (i32, i32, i32) {
    %c0_i32 = arith.constant 0 : i32
    %c0_i32_0 = arith.constant 0 : i32
    return %arg0, %c0_i32, %arg1 : i32, i32, i32
  }
}

</mosaic_0001>

<bundles_post_ra>
// kernel: _nettc_forward.1
= control target key start
LH: loop header
LB: loop body
LE: loop exit
PB: predicated region body
PF: predicated region fallthrough
CT: control target
= control target key end

     0   :  { %s551_s12 = smov 0   ;;  %s553_s13 = smov 0   ;;  %s670_s0 = inlined_call_operand.vmem [shape: f32[32,8], index: 0, kind: input, shape index: {}]   ;;  %s671_s1 = inlined_call_operand.vmem [shape: f32[2,8,512], index: 1, kind: input, shape index: {}]   ;;  %s672_s2 = inlined_call_operand.vmem [shape: f32[32,1], index: 2, kind: input, shape index: {}]   ;;  %s673_s3 = inlined_call_operand.vmem [shape: f32[2,32,512], index: 3, kind: output, shape index: {}]  }
   0x1   :  { %s555_s14 = smov 0   ;;  %s557_s15 = smov 0  }
   0x2   :  { %s559_s16 = smov 0   ;;  %s561_s17 = smov 0  }
   0x3   :  { %s563_s18 = smov 0  }
   0x4 LB: > { %s22_s19 = sadd.s32 1, %s520_s16  ;;  %s25_s20 = sadd.s32 1, %s524_s17  ;;  %s528_s18 = sphi %s563_s18, %s13_s18   ;;  %s524_s17 = sphi %s561_s17, %s680_s17   ;;  %s520_s16 = sphi %s559_s16, %s679_s16   ;;  %s516_s15 = sphi %s557_s15, %s678_s15   ;;  %s512_s14 = sphi %s555_s14, %s677_s14   ;;  %s508_s13 = sphi %s553_s13, %s676_s13   ;;  %s504_s12 = sphi %s551_s12, %s675_s12  }
   0x5   : > { %p23_p0 = scmp.ge.s32.totalorder %s22_s19, 4  ;;  %s395_s21 = sadd.s32 4294967295, %s528_s18  }
   0x6   : > { %p114_p1 = scmp.ne.s32.totalorder %s508_s13, %s504_s12  ;;  %p115_p2 = scmp.eq.s32.totalorder %s395_s21, 7 }
   0x7   : > { %s682_s19 = smov (%p23_p0, %s22_s19), 0  ;;  %s684_s20 = smov (!%p23_p0, %s25_s20), %s524_s17 }
   0x8   : > { %s100_s22 = ssub.s32 %s520_s16, %s682_s19  ;;  %p27_p3 = scmp.ge.s32.totalorder %s684_s20, 2 }
   0x9   : > { %p399_p4 = scmp.ge.s32.totalorder %s528_s18, 1  ;;  %p597_p5 = por %p115_p2, %p114_p1 }
   0xa   : > { %p156_p6 = scmp.lt.s32.totalorder %s528_s18, 9  ;;  %s686_s20 = smov (%p27_p3, %s684_s20), 0 }
   0xb   : > { %s99_s24 = ssub.s32 %s524_s17, %s686_s20  ;;  %s104_s26 = sadd.s32 1, %s508_s13 }
   0xc   : > { %p157_p7 = pnand %p399_p4, %p156_p6  ;;  %s101_s25 = sor.u32 %s100_s22, %s99_s24 }
   0xd   : > { %p102_p8 = scmp.eq.s32.totalorder %s101_s25, 0  ;;  %p182_p9 = scmp.lt.s32.totalorder (!%p157_p7), %s516_s15, 1 }
   0xe   : > { %160 = sbr.rel (%p157_p7) target bundleno = 175 (0xaf), region = 32  ;;  %p184_p10 = scmp.lt.s32.totalorder (!%p157_p7), %s512_s14, 3 }
   0xf   : > { %s608_s27 = scalar_select %p102_p8, %s508_s13, %s104_s26  }
  0x13   : > { %v530_v0 = vmov 0   ;;  %v197_v1 = vld [vmem:[%s672_s2 + $0x10] sm:$0xff]  ;;  %s183_s30 = scalar_select %p182_p9, %s516_s15, 1  ;;  %v195_v2 = vld [vmem:[%s672_s2] sm:$0xff]  ;;  %vm219_vm0 = vcmask 64512   ;;  %v191_v5 = vld [vmem:[%s670_s0 + $0x8] sm:$0xff] }
  0x14   : > { %473 = vset.pattern.permute.xlu1 %v530_v0  ;;  %472 = vset.pattern.permute.xlu0 %v530_v0  ;;  %s185_s6 = scalar_select %p184_p10, %s512_s14, 3  ;;  %v190_v4 = vld [vmem:[%s670_s0] sm:$0xff]  ;;  %v192_v6 = vld [vmem:[%s670_s0 + $0x10] sm:$0xff]  ;;  %v193_v7 = vld [vmem:[%s670_s0 + $0x18] sm:$0xff] }
  0x15   : > { %211 = vperm.xlu1 %473, %v197_v1   ;;  %201 = vperm.xlu0 %472, %v195_v2   ;;  %s401_s7 = sshll.u32 %s183_s30, 2  ;;  %v198_v8 = vld [vmem:[%s672_s2 + $0x18] sm:$0xff]  ;;  %v196_v9 = vld [vmem:[%s672_s2 + $0x8] sm:$0xff] }
  0x16   : > { %s187_s8 = sadd.s32 %s401_s7, %s185_s6 }
  0x17   : > { %s402_s9 = sshll.u32 %s187_s8, 3 }
  0x18   : > { %s189_s21 = scalar_lea.vmem %s671_s1, %s402_s9  ;;  %s179_s9 = sand.u32 1, %s504_s12  }
  0x19   : > { %v194_v3 = vld [vmem:[%s189_s21] sm:$0xff]  ;;  %s400_s10 = sshll.u32 %s179_s9, 5  ;;  %s408_s12 = sshll.u32 (%p597_p5), %s516_s15, 4 }
  0x1a   : > { %247 = vmatpush.msra.mxu0 %v194_v3  ;;  %412 = vmatpush.msra.mxu1 %v194_v3  ;;  %s181_s11 = scalar_lea.vmem [#allocation2], %s400_s10  ;;  %s277_s21 = sadd.s32 (%p597_p5), %s512_s14, %s408_s12 }
  0x1b   : > { %413 = vmatpush.msra.mxu2 %v194_v3  ;;  %414 = vmatpush.msra.mxu3 %v194_v3  ;;  %s409_s22 = sshll.u32 (%p597_p5), %s277_s21, 3 }
  0x1c   : > { %403 = vmatmul.msk.f32.vlgmr.msra.gmra.mxu0 %vm219_vm0, %v190_v4  ;;  %404 = vmatmul.msk.f32.vlgmr.msra.gmra.mxu1 %vm219_vm0, %v191_v5  ;;  %s279_s26 = scalar_lea.vmem (%p597_p5), %s673_s3, %s409_s22 }
  0x1d   : > { %405 = vmatmul.msk.f32.vlgmr.msra.gmra.mxu2 %vm219_vm0, %v192_v6  ;;  %406 = vmatmul.msk.f32.vlgmr.msra.gmra.mxu3 %vm219_vm0, %v193_v7 }
  0x1e   : > { %216 = vperm.xlu1 %473, %v198_v8   ;;  %206 = vperm.xlu0 %472, %v196_v9  }
  0x87   : > { %v202_v10 = vpop.permute.xlu0 %201  ;;  %v212_v11 = vpop.permute.xlu1 %211 }
  0x90   : > { %v207_v12 = vpop.permute.xlu0 %206  ;;  %v217_v19 = vpop.permute.xlu1 %216 }
  0x99   : > { %v249_v13 = vpop.f32.mrf.mxu0  ;;  %v252_v14 = vpop.f32.mrf.mxu1 }
  0x9a   : > { %v250_v15 = vadd.f32 %v249_v13, %v202_v10  ;;  %v253_v16 = vadd.f32 %v252_v14, %v207_v12 }
  0x9c   : > { %v261_v17 = vmax.f32 %v250_v15, 0.0  ;;  %v262_v18 = vmax.f32 %v253_v16, 0.0 }
  0x9e   : > { %265 = vst [vmem:[%s181_s11] sm:$0xff] %v261_v17 }
  0x9f   : > { %266 = vst [vmem:[%s181_s11 + $0x8] sm:$0xff] %v262_v18 }
  0xa0   : > { %v255_v20 = vpop.f32.mrf.mxu2  ;;  %v258_v21 = vpop.f32.mrf.mxu3 }
  0xa1   : > { %v256_v22 = vadd.f32 %v255_v20, %v212_v11  ;;  %v259_v23 = vadd.f32 %v258_v21, %v217_v19 }
  0xa2   : > { %275 = sbr.rel (!%p597_p5) target bundleno = 175 (0xaf), region = 36 }
  0xa3   : > { %v263_v24 = vmax.f32 %v256_v22, 0.0  ;;  %v264_v25 = vmax.f32 %v259_v23, 0.0 }
  0xa5   : > { %267 = vst [vmem:[%s181_s11 + $0x10] sm:$0xff] %v263_v24  ;;  %v314_v26 = vld [vmem:[%s181_s11] sm:$0xff] (%p597_p5) }
  0xa6   : > { %268 = vst [vmem:[%s181_s11 + $0x18] sm:$0xff] %v264_v25  ;;  %v316_v27 = vld [vmem:[%s181_s11 + $0x8] sm:$0xff] (%p597_p5) }
  0xa7   : > { %315 = vst [vmem:[%s279_s26] sm:$0xff] %v314_v26 }
  0xa8   : > { %317 = vst [vmem:[%s279_s26 + $0x20] sm:$0xff] %v316_v27 }
  0xac   : > { %v318_v28 = vld [vmem:[%s181_s11 + $0x10] sm:$0xff] }
  0xad   : > { %v320_v29 = vld [vmem:[%s181_s11 + $0x18] sm:$0xff]  ;;  %319 = vst [vmem:[%s279_s26 + $0x40] sm:$0xff] %v318_v28 }
  0xae   : > { %321 = vst [vmem:[%s279_s26 + $0x60] sm:$0xff] %v320_v29 }
  0xaf PF: > { %s13_s18 = sadd.s32 1, %s528_s18   ;;  %s675_s12 = smov %s508_s13 }
  0xb0   : > { %p10_p11 = scmp.ge.s32.totalorder %s13_s18, 10   ;;  %s676_s13 = smov %s608_s27 }
  0xb1   : > { %s677_s14 = smov %s520_s16  ;;  %s678_s15 = smov %s524_s17 }
  0xb2   : > { %s679_s16 = smov %s682_s19  ;;  %s680_s17 = smov %s686_s20 }
  0xb3   :  { %12 = sbr.rel (!%p10_p11) target bundleno = 4 (0x4), region = 100 }

</bundles_post_ra>
